<compile_context>
chip_gen: v7x
topology: tpu7x:2x2x1
jax: 0.10.0
libtpu: 0.0.40
codegen_flags: <defaults>
</compile_context>

<pallas_src>
import jax
import jax.numpy as jnp
from jax.experimental import pallas as pl
from jax.experimental.pallas import tpu as pltpu


def _round_up(x, m):
    return ((x + m - 1) // m) * m


def _vmem_info():
    """Returns (physical VMEM bytes, scoped vmem_limit_bytes to request)."""
    phys = None
    try:
        phys = int(getattr(pltpu.get_tpu_info(), "vmem_capacity_bytes"))
    except Exception:
        phys = None
    if not phys:
        phys = 64 * 1024 * 1024  # conservative fallback: v7x per-TC VMEM
    # Leave headroom for compiler-internal scratch: ~96 MiB on v5e/v6e
    # (well past their 16/32 MiB default scoped limits), ~48 MiB on v7x.
    return phys, int(phys * 3 // 4)


def _auto_tile_f(Fp, bm, Dp, Kp, tile_budget_bytes):
    """Largest tile_f (multiple of 128, divisor of Fp) whose double-buffered
    pipelined working set fits the per-chip VMEM budget."""
    # Resident / constant-index blocks (double-buffered by default).
    fixed = (bm * Dp * 4          # f32 accumulator scratch
             + 2 * Dp * Kp * 2    # text_features.T (bf16)
             + 2 * Dp * 4         # bias (f32)
             + 2 * bm * Kp * 4)   # output block (f32)
    # Per-F-element bytes of the double-buffered streamed tiles.
    per_f = 2 * (bm * 2           # image tile (bf16)
                 + 4              # prompt row (f32)
                 + Dp * 2)        # encoder weight tile (bf16)
    avail = max(tile_budget_bytes - fixed, per_f * 128)
    tile_f = min(Fp, max(128, (avail // per_f) // 128 * 128))
    while Fp % tile_f != 0:       # keep the reduction grid exact
        tile_f -= 128
    return int(tile_f)


# ------------------------------------------------------------------ kernel ---

def custom_clip_kernel(x_ref, p_ref, w_ref, b_ref, t_ref, scale_ref,
                       o_ref, acc_ref):
    # x_ref     : (bm, tile_f)  bf16  flattened image tile (batch block i)
    # p_ref     : (1,  tile_f)  f32   flattened visual-prompt tile
    # w_ref     : (tile_f, Dp)  bf16  synthetic image-encoder projection tile
    # b_ref     : (1,  Dp)      f32   encoder bias (padded)
    # t_ref     : (Dp, Kp)      bf16  text_features.T (padded, precomputed)
    # scale_ref : (1,)          f32   logit_scale (SMEM)
    # o_ref     : (bm, Kp)      f32   logits for batch block i (padded)
    # acc_ref   : (bm, Dp)      f32   VMEM accumulator over the F reduction
    k = pl.program_id(1)

    @pl.when(k == 0)
    def _init():
        acc_ref[...] = jnp.zeros_like(acc_ref)

    # Fused FixedPatchPrompter: widen the bf16 image to f32, add the f32
    # prompt (VPU), re-cast to bf16 for the MXU; accumulate the encode_image
    # projection in f32.
    x = (x_ref[...].astype(jnp.float32) + p_ref[...]).astype(jnp.bfloat16)
    acc_ref[...] += jnp.dot(x, w_ref[...], preferred_element_type=jnp.float32)

    @pl.when(k == pl.num_programs(1) - 1)
    def _finalize():
        feat = acc_ref[...] + b_ref[...]
        # image_features / image_features.norm(dim=-1, keepdim=True)
        ssq = jnp.sum(feat * feat, axis=-1, keepdims=True)
        inv = jax.lax.rsqrt(ssq + 1e-12)           # EUP slot, no VPU divide
        fn = (feat * inv).astype(jnp.bfloat16)
        # similarity = image_features @ text_features.T
        sim = jnp.dot(fn, t_ref[...], preferred_element_type=jnp.float32)
        # logits = similarity * logit_scale   (f32 epilogue, PyTorch op order)
        o_ref[...] = sim * scale_ref[0]


# ----------------------------------------------------------------- wrappers --

def prepare_params(prompt_full, w_enc, b_enc, text_features, logit_scale):
    """One-time (init-style) padding / casting / transposing of parameters."""
    _, C, H, W = prompt_full.shape
    F = C * H * W
    Fw, D = w_enc.shape
    assert Fw == F
    K, Dt = text_features.shape
    assert Dt == D
    Fp = _round_up(F, 128)
    Dp = _round_up(D, 128)
    Kp = _round_up(K, 128)
    return {
        # FixedPatchPrompter canvas, flattened to the lane-dense layout.
        "prompt_flat": jnp.pad(prompt_full.reshape(1, F),
                               ((0, 0), (0, Fp - F))).astype(jnp.float32),
        # Encoder weights: zero-pad F/D, bf16 for the MXU.
        "w_enc": jnp.pad(w_enc, ((0, Fp - F), (0, Dp - D))).astype(jnp.bfloat16),
        "b_enc": jnp.pad(b_enc, ((0, 0), (0, Dp - D))).astype(jnp.float32),
        # text_features.T, padded and bf16-cast ONCE (not per forward call).
        "text_t": jnp.pad(text_features,
                          ((0, Kp - K), (0, Dp - D))).astype(jnp.bfloat16).T,
        "logit_scale": jnp.asarray(logit_scale, jnp.float32).reshape(1),
        "num_classes": int(K),
    }


def custom_clip_forward(image, params, *, tile_f=None, batch_tile=None):
    """Reproduces CustomCLIP.forward(image) -> (B, num_classes) logits."""
    B, C, H, W = image.shape
    F = C * H * W
    Fp, Dp = params["w_enc"].shape
    Dp2, Kp = params["text_t"].shape
    assert Dp2 == Dp
    K = params["num_classes"]

    phys_vmem, vmem_limit = _vmem_info()

    # Batch tiling: fill the MXU M dimension (up to 256 rows) and expose a
    # "parallel" axis that megacore (v7x) can shard across TensorCores.
    if batch_tile is None:
        batch_tile = min(_round_up(B, 8), 256)
    Bp = _round_up(B, batch_tile)
    nb = Bp // batch_tile

    # F-reduction tiling: largest 128-multiple divisor of Fp whose
    # double-buffered working set fits ~35% of physical VMEM (~22 MiB on v7x,
    # ~45 MiB on v5e/v6e).  At toy sizes this resolves to tile_f == Fp.
    if tile_f is None:
        tile_f = _auto_tile_f(Fp, batch_tile, Dp, Kp, int(phys_vmem * 0.35))
    assert Fp % tile_f == 0 and tile_f % 128 == 0
    n_steps = Fp // tile_f

    # bf16 image halves image-side HBM/VMEM traffic.  Padded batch rows
    # produce garbage logits that are sliced off below (zero-mask them only
    # if Bp >> B in a real deployment).
    x = jnp.pad(image.reshape(B, F),
                ((0, Bp - B), (0, Fp - F))).astype(jnp.bfloat16)

    cost = pl.CostEstimate(
        flops=int(2 * Bp * Fp * Dp + 2 * Bp * Dp * Kp),
        transcendentals=int(Bp),
        bytes_accessed=int(Bp * Fp * 2 + Bp * Kp * 4
                           + nb * (Fp * Dp * 2 + Fp * 4 + Dp * 4 + Dp * Kp * 2)),
    )

    logits_p = pl.pallas_call(
        custom_clip_kernel,
        out_shape=jax.ShapeDtypeStruct((Bp, Kp), jnp.float32),
        grid_spec=pltpu.PrefetchScalarGridSpec(
            num_scalar_prefetch=0,
            grid=(nb, n_steps),
            in_specs=[
                pl.BlockSpec((batch_tile, tile_f), lambda i, k: (i, k)),  # image
                pl.BlockSpec((1, tile_f), lambda i, k: (0, k)),           # prompt
                pl.BlockSpec((tile_f, Dp), lambda i, k: (k, 0)),          # w_enc
                # NOTE: at real CLIP D/K, give these constant-index blocks
                # pipeline_mode=pl.Buffered(1) to reclaim their second VMEM
                # buffer; negligible at Dp=Kp=128 so left default here.
                pl.BlockSpec((1, Dp), lambda i, k: (0, 0)),               # b_enc
                pl.BlockSpec((Dp, Kp), lambda i, k: (0, 0)),              # text.T
                pl.BlockSpec(memory_space=pltpu.SMEM),                    # scale
            ],
            out_specs=pl.BlockSpec((batch_tile, Kp), lambda i, k: (i, 0)),
            scratch_shapes=[pltpu.VMEM((batch_tile, Dp), jnp.float32)],
        ),
        compiler_params=pltpu.CompilerParams(
            # Batch tiles are independent (megacore-shardable on v7x); the F
            # axis is a reduction and stays "arbitrary" and last.
            dimension_semantics=("parallel", "arbitrary"),
            vmem_limit_bytes=int(vmem_limit),
        ),
        cost_estimate=cost,
    )(x, params["prompt_flat"], params["w_enc"], params["b_enc"],
      params["text_t"], params["logit_scale"])

    return logits_p[:B, :K]


# --------------------------------------------------------------------- main --

if __name__ == "__main__":
    key = jax.random.PRNGKey(0)
    k_img, k_patch, k_w, k_b, k_txt = jax.random.split(key, 5)

    B, C, H, W = 2, 3, 16, 16      # small NCHW image, like PyTorch
    D = 32                         # CLIP joint-embedding dim (synthetic)
    K = 8                          # number of class prompts
    PSIZE = 4                      # FixedPatchPrompter patch size
    F = C * H * W

    image = jax.random.normal(k_img, (B, C, H, W), jnp.float32)

    # FixedPatchPrompter parameter: learnable patch scattered into a zero canvas.
    patch = 0.1 * jax.random.normal(k_patch, (1, C, PSIZE, PSIZE), jnp.float32)
    prompt_full = jnp.zeros((1, C, H, W), jnp.float32).at[:, :, :PSIZE, :PSIZE].set(patch)

    # Synthetic image encoder (stand-in for clip_model.encode_image).
    w_enc = 0.02 * jax.random.normal(k_w, (F, D), jnp.float32)
    b_enc = 0.02 * jax.random.normal(k_b, (1, D), jnp.float32)

    # Text features: precomputed + L2-normalized in __init__.
    text_features = jax.random.normal(k_txt, (K, D), jnp.float32)
    text_features = text_features / jnp.linalg.norm(text_features, axis=-1, keepdims=True)

    # logit_scale = clip_model.logit_scale.exp(); CLIP init is ln(1/0.07).
    logit_scale = jnp.exp(jnp.log(jnp.array([1.0 / 0.07], jnp.float32)))

    params = prepare_params(prompt_full, w_enc, b_enc, text_features, logit_scale)

    # ---- references -----------------------------------------------------
    # Exact f32 reference (PyTorch module math).
    ref_prompted = image + prompt_full
    ref_feat = ref_prompted.reshape(B, F) @ w_enc + b_enc
    ref_feat = ref_feat / jnp.linalg.norm(ref_feat, axis=-1, keepdims=True)
    ref_logits = (ref_feat @ text_features.T) * logit_scale[0]

    # Reference matching the kernel's precision choices exactly
    # (bf16 image input, bf16 MXU operands, f32 accumulation + f32 epilogue).
    xb = image.reshape(B, F).astype(jnp.bfloat16).astype(jnp.float32)
    xp = (xb + prompt_full.reshape(1, F)).astype(jnp.bfloat16)
    sim_feat = jnp.dot(xp, w_enc.astype(jnp.bfloat16),
                       preferred_element_type=jnp.float32) + b_enc
    sim_inv = jax.lax.rsqrt(jnp.sum(sim_feat * sim_feat, axis=-1, keepdims=True)
                            + 1e-12)
    sim_fn = (sim_feat * sim_inv).astype(jnp.bfloat16)
    sim_logits = jnp.dot(sim_fn, text_features.astype(jnp.bfloat16).T,
                         preferred_element_type=jnp.float32) * logit_scale[0]

    # ---- run kernel: auto tile (single reduction step at toy F) plus a
    # forced 3-step reduction to exercise the accumulator grid path.
    for tile_f in (None, 256):
        logits = custom_clip_forward(image, params, tile_f=tile_f)
        jax.block_until_ready(logits)
        assert logits.shape == (B, K)
        # Tight check vs. a reference with the same precision choices.
        assert jnp.allclose(logits, sim_logits, atol=5e-3, rtol=5e-3), (
            f"bf16-sim mismatch (tile_f={tile_f}): "
            f"{jnp.max(jnp.abs(logits - sim_logits))}")
        # Sanity check vs. the full-f32 module math (bf16-level tolerance).
        assert jnp.allclose(logits, ref_logits, atol=1e-1, rtol=5e-2), (
            f"f32-ref mismatch (tile_f={tile_f}): "
            f"{jnp.max(jnp.abs(logits - ref_logits))}")

    print("KERNEL_OK")
</pallas_src>

<mosaic_0001>
module attributes {stable_mosaic.version = 11 : i64} {
  func.func @custom_clip_kernel(%arg0: i32, %arg1: i32, %arg2: memref<8x768xbf16, #tpu.memory_space<vmem>>, %arg3: memref<1x768xf32, #tpu.memory_space<vmem>>, %arg4: memref<768x128xbf16, #tpu.memory_space<vmem>>, %arg5: memref<1x128xf32, #tpu.memory_space<vmem>>, %arg6: memref<128x128xbf16, #tpu.memory_space<vmem>>, %arg7: memref<1xf32, #tpu.memory_space<smem>>, %arg8: memref<8x128xf32, #tpu.memory_space<vmem>>, %arg9: memref<8x128xf32, #tpu.memory_space<vmem>>) attributes {dimension_semantics = [#tpu.dimension_semantics<parallel>, #tpu.dimension_semantics<arbitrary>], iteration_bounds = array<i64: 1, 1>, scalar_prefetch = 0 : i64, scratch_operands = 1 : i64, tpu.core_type = #tpu.core_type<tc>, window_params = [{transform_indices = @transform_0, window_bounds = array<i64: 8, 768>}, {transform_indices = @transform_1, window_bounds = array<i64: 1, 768>}, {transform_indices = @transform_2, window_bounds = array<i64: 768, 128>}, {pipeline_mode = #tpu.pipeline_mode<synchronous>, transform_indices = @transform_3, window_bounds = array<i64: 1, 128>}, {pipeline_mode = #tpu.pipeline_mode<synchronous>, transform_indices = @transform_4, window_bounds = array<i64: 128, 128>}, {transform_indices = @transform_5, window_bounds = array<i64: 1>}, {transform_indices = @transform_6, window_bounds = array<i64: 8, 128>}]} {
    %c0_i32 = arith.constant 0 : i32
    %0 = arith.cmpi eq, %arg1, %c0_i32 : i32
    %1 = arith.extui %0 : i1 to i32
    %c0_i32_0 = arith.constant 0 : i32
    %2 = arith.cmpi ne, %1, %c0_i32_0 : i32
    scf.if %2 {
      %cst_12 = arith.constant 0.000000e+00 : f32
      %17 = vector.broadcast %cst_12 : f32 to vector<8x128xf32>
      %c0_13 = arith.constant 0 : index
      %c0_14 = arith.constant 0 : index
      %18 = vector.load %arg9[%c0_13, %c0_14] : memref<8x128xf32, #tpu.memory_space<vmem>>, vector<8x128xf32>
      tpu.vector_store %arg9[%c0_13, %c0_14], %17 {strides = array<i32>} : memref<8x128xf32, #tpu.memory_space<vmem>>, vector<8x128xf32>,
    } else {
    }
    %c0 = arith.constant 0 : index
    %c0_1 = arith.constant 0 : index
    %3 = vector.load %arg2[%c0, %c0_1] : memref<8x768xbf16, #tpu.memory_space<vmem>>, vector<8x768xbf16>
    %4 = arith.extf %3 : vector<8x768xbf16> to vector<8x768xf32>
    %c0_2 = arith.constant 0 : index
    %c0_3 = arith.constant 0 : index
    %5 = vector.load %arg3[%c0_2, %c0_3] : memref<1x768xf32, #tpu.memory_space<vmem>>, vector<1x768xf32>
    %6 = vector.broadcast %5 : vector<1x768xf32> to vector<8x768xf32>
    %7 = arith.addf %4, %6 : vector<8x768xf32>
    %8 = arith.truncf %7 : vector<8x768xf32> to vector<8x768xbf16>
    %c0_4 = arith.constant 0 : index
    %c0_5 = arith.constant 0 : index
    %9 = vector.load %arg9[%c0_4, %c0_5] : memref<8x128xf32, #tpu.memory_space<vmem>>, vector<8x128xf32>
    %c0_6 = arith.constant 0 : index
    %c0_7 = arith.constant 0 : index
    %10 = vector.load %arg4[%c0_6, %c0_7] : memref<768x128xbf16, #tpu.memory_space<vmem>>, vector<768x128xbf16>
    %cst = arith.constant dense<0.000000e+00> : vector<8x128xf32>
    %11 = tpu.matmul %8, %10, %cst {dimension_numbers = #tpu.dot_dimension_numbers<[1], [0], [0], [1], [0, 0, 1, 1], [], []>} : vector<8x768xbf16>, vector<768x128xbf16>, vector<8x128xf32> -> vector<8x128xf32>
    %12 = arith.addf %9, %11 : vector<8x128xf32>
    %c0_8 = arith.constant 0 : index
    %c0_9 = arith.constant 0 : index
    %13 = vector.load %arg9[%c0_8, %c0_9] : memref<8x128xf32, #tpu.memory_space<vmem>>, vector<8x128xf32>
    tpu.vector_store %arg9[%c0_8, %c0_9], %12 {strides = array<i32>} : memref<8x128xf32, #tpu.memory_space<vmem>>, vector<8x128xf32>,
    %c0_i32_10 = arith.constant 0 : i32
    %14 = arith.cmpi eq, %arg1, %c0_i32_10 : i32
    %15 = arith.extui %14 : i1 to i32
    %c0_i32_11 = arith.constant 0 : i32
    %16 = arith.cmpi ne, %15, %c0_i32_11 : i32
    scf.if %16 {
      %c0_12 = arith.constant 0 : index
      %c0_13 = arith.constant 0 : index
      %17 = vector.load %arg9[%c0_12, %c0_13] : memref<8x128xf32, #tpu.memory_space<vmem>>, vector<8x128xf32>
      %c0_14 = arith.constant 0 : index
      %c0_15 = arith.constant 0 : index
      %18 = vector.load %arg5[%c0_14, %c0_15] : memref<1x128xf32, #tpu.memory_space<vmem>>, vector<1x128xf32>
      %19 = vector.broadcast %18 : vector<1x128xf32> to vector<8x128xf32>
      %20 = arith.addf %17, %19 : vector<8x128xf32>
      %21 = arith.mulf %20, %20 : vector<8x128xf32>
      %cst_16 = arith.constant dense<0.000000e+00> : vector<8xf32>
      %22 = vector.multi_reduction <add>, %21, %cst_16 [1] : vector<8x128xf32> to vector<8xf32>
      %23 = vector.shape_cast %22 : vector<8xf32> to vector<8x1xf32>
      %cst_17 = arith.constant 9.99999996E-13 : f32
      %24 = vector.broadcast %cst_17 : f32 to vector<8x1xf32>
      %25 = arith.addf %23, %24 : vector<8x1xf32>
      %26 = math.rsqrt %25 : vector<8x1xf32>
      %27 = vector.broadcast %26 : vector<8x1xf32> to vector<8x128xf32>
      %28 = arith.mulf %20, %27 : vector<8x128xf32>
      %29 = arith.truncf %28 : vector<8x128xf32> to vector<8x128xbf16>
      %c0_18 = arith.constant 0 : index
      %c0_19 = arith.constant 0 : index
      %30 = vector.load %arg6[%c0_18, %c0_19] : memref<128x128xbf16, #tpu.memory_space<vmem>>, vector<128x128xbf16>
      %cst_20 = arith.constant dense<0.000000e+00> : vector<8x128xf32>
      %31 = tpu.matmul %29, %30, %cst_20 {dimension_numbers = #tpu.dot_dimension_numbers<[1], [0], [0], [1], [0, 0, 1, 1], [], []>} : vector<8x128xbf16>, vector<128x128xbf16>, vector<8x128xf32> -> vector<8x128xf32>
      %c0_21 = arith.constant 0 : index
      %32 = memref.load %arg7[%c0_21] : memref<1xf32, #tpu.memory_space<smem>>
      %33 = vector.broadcast %32 : f32 to vector<8x128xf32>
      %34 = arith.mulf %31, %33 : vector<8x128xf32>
      %c0_22 = arith.constant 0 : index
      %c0_23 = arith.constant 0 : index
      %35 = vector.load %arg8[%c0_22, %c0_23] : memref<8x128xf32, #tpu.memory_space<vmem>>, vector<8x128xf32>
      tpu.vector_store %arg8[%c0_22, %c0_23], %34 {strides = array<i32>} : memref<8x128xf32, #tpu.memory_space<vmem>>, vector<8x128xf32>,
    } else {
    }
    return
  }
  func.func @transform_0(%arg0: i32, %arg1: i32) -> (i32, i32) {
    %c0_i32 = arith.constant 0 : i32
    return %arg0, %arg1 : i32, i32
  }
  func.func @transform_1(%arg0: i32, %arg1: i32) -> (i32, i32) {
    %c0_i32 = arith.constant 0 : i32
    %c0_i32_0 = arith.constant 0 : i32
    return %c0_i32, %arg1 : i32, i32
  }
  func.func @transform_2(%arg0: i32, %arg1: i32) -> (i32, i32) {
    %c0_i32 = arith.constant 0 : i32
    %c0_i32_0 = arith.constant 0 : i32
    return %arg1, %c0_i32 : i32, i32
  }
  func.func @transform_3(%arg0: i32, %arg1: i32) -> (i32, i32) {
    %c0_i32 = arith.constant 0 : i32
    %c0_i32_0 = arith.constant 0 : i32
    %c0_i32_1 = arith.constant 0 : i32
    return %c0_i32, %c0_i32_0 : i32, i32
  }
  func.func @transform_4(%arg0: i32, %arg1: i32) -> (i32, i32) {
    %c0_i32 = arith.constant 0 : i32
    %c0_i32_0 = arith.constant 0 : i32
    %c0_i32_1 = arith.constant 0 : i32
    return %c0_i32, %c0_i32_0 : i32, i32
  }
  func.func @transform_5(%arg0: i32, %arg1: i32) -> i32 {
    %c0_i32 = arith.constant 0 : i32
    %c0_i32_0 = arith.constant 0 : i32
    return %c0_i32 : i32
  }
  func.func @transform_6(%arg0: i32, %arg1: i32) -> (i32, i32) {
    %c0_i32 = arith.constant 0 : i32
    %c0_i32_0 = arith.constant 0 : i32
    return %arg0, %c0_i32 : i32, i32
  }
}

</mosaic_0001>

<bundles_post_ra>
// kernel: tpu_custom_call.1
= control target key start
LH: loop header
LB: loop body
LE: loop exit
PB: predicated region body
PF: predicated region fallthrough
CT: control target
= control target key end

     0   :  { %12 = vsyncpa [#allocation5], 0  ;;  %s1199_s0 = inlined_call_operand.hbm [shape: bf16[8,768], index: 0, kind: input, shape index: {}]   ;;  %s1200_s1 = inlined_call_operand.vmem [shape: f32[1,768], index: 1, kind: input, shape index: {}]   ;;  %s1201_s2 = inlined_call_operand.hbm [shape: bf16[768,128], index: 2, kind: input, shape index: {}]   ;;  %s1202_s3 = inlined_call_operand.vmem [shape: f32[1,128], index: 3, kind: input, shape index: {}]   ;;  %s1203_s4 = inlined_call_operand.hbm [shape: bf16[128,128], index: 4, kind: input, shape index: {}]   ;;  %s1204_s5 = inlined_call_operand.<no memory space> [shape: f32[1], index: 5, kind: input, shape index: {}]   ;;  %s1205_s6 = inlined_call_operand.hbm [shape: f32[8,128], index: 6, kind: output, shape index: {}]  }
   0x1   :  { %13 = vsyncpa [#allocation8], 0 }
   0x2   :  { %14 = vsyncpa [#allocation6], 0  ;;  %s1085_s21 = smov [#allocation7]   ;;  %s991_s25 = scalar_lea.hbm %s1201_s2, 6144 }
   0x3   :  { %s32_s22 = sshll.u32 %s1085_s21, 4  ;;  %p992_p0 = scmp.ne.s32.totalorder %s1201_s2, %s991_s25  ;;  %s33_s22 = int_to_ptr.vmem [resolvable:$true] %s32_s22 }
   0x4   :  { %p995_p1 = scmp.lt.u32.totalorder %s991_s25, %s1201_s2 }
   0x6   :  { %p997_p2 = pnand %p995_p1, %p992_p0 }
   0x8   :  { %1000 = shalt.err (!%p997_p2)
}
   0x9   :  { %s1001_s30 = scalar_lea.vmem %s33_s22, 6144  ;;  %p1006_p4 = scmp.lt.s32.totalorder %s33_s22, %s33_s22 }
   0xa   :  { %p1002_p3 = scmp.ne.s32.totalorder %s33_s22, %s1001_s30  ;;  %p1007_p5 = scmp.lt.s32.totalorder %s1001_s30, %s1001_s30 }
   0xc   :  { %p1008_p6 = por %p1007_p5, %p1006_p4 }
   0xe   :  { %p1009_p7 = pnand %p1008_p6, %p1002_p3 }
  0x10   :  { %1012 = shalt.err (!%p1009_p7)
}
  0x11   :  { %s1086_s7 = smov 64   ;;  %s1087_s8 = smov 4  }
  0x12   :  { %38 = dma.hbm_to_vmem [thread:$0]  %s1201_s2, 6144, %s33_s22, [#allocation8], %s1086_s7, %s1086_s7, %s1087_s8  }
  0x13   :  { %s1088_s11 = smov [#allocation4]   ;;  %s1089_s13 = smov [#allocation9]  }
  0x14   :  { %s21_s12 = sshll.u32 %s1088_s11, 4  ;;  %s46_s14 = sshll.u32 %s1089_s13, 4  ;;  %s22_s12 = int_to_ptr.vmem [resolvable:$true] %s21_s12  ;;  %s47_s14 = int_to_ptr.vmem [resolvable:$true] %s46_s14 }
  0x15   :  { %s1013_s17 = scalar_lea.hbm %s1199_s0, 384 }
  0x16   :  { %p1014_p8 = scmp.ne.s32.totalorder %s1199_s0, %s1013_s17  ;;  %p1017_p9 = scmp.lt.u32.totalorder %s1013_s17, %s1199_s0 }
  0x18   :  { %p1019_p10 = pnand %p1017_p9, %p1014_p8 }
  0x1a   :  { %1022 = shalt.err (!%p1019_p10)
}
  0x1b   :  { %s1023_s2 = scalar_lea.vmem %s22_s12, 384  ;;  %p1028_p12 = scmp.lt.s32.totalorder %s22_s12, %s22_s12 }
  0x1c   :  { %p1024_p11 = scmp.ne.s32.totalorder %s22_s12, %s1023_s2  ;;  %p1029_p13 = scmp.lt.s32.totalorder %s1023_s2, %s1023_s2 }
  0x1e   :  { %p1030_p0 = por %p1029_p13, %p1028_p12 }
  0x20   :  { %p1031_p1 = pnand %p1030_p0, %p1024_p11 }
  0x22   :  { %1034 = shalt.err (!%p1031_p1)
}
  0x23   :  { %24 = dma.hbm_to_vmem [thread:$0]  %s1199_s0, 384, %s22_s12, [#allocation5]  }
  0x24   :  { %s1035_s26 = scalar_lea.hbm %s1203_s4, 1024 }
  0x25   :  { %p1036_p2 = scmp.ne.s32.totalorder %s1203_s4, %s1035_s26  ;;  %p1039_p3 = scmp.lt.u32.totalorder %s1035_s26, %s1203_s4 }
  0x27   :  { %p1041_p4 = pnand %p1039_p3, %p1036_p2 }
  0x29   :  { %1044 = shalt.err (!%p1041_p4)
}
  0x2a   :  { %s1045_s9 = scalar_lea.vmem %s47_s14, 1024  ;;  %p1050_p6 = scmp.lt.s32.totalorder %s47_s14, %s47_s14 }
  0x2b   :  { %p1046_p5 = scmp.ne.s32.totalorder %s47_s14, %s1045_s9  ;;  %p1051_p7 = scmp.lt.s32.totalorder %s1045_s9, %s1045_s9 }
  0x2d   :  { %p1052_p8 = por %p1051_p7, %p1050_p6 }
  0x2f   :  { %p1053_p9 = pnand %p1052_p8, %p1046_p5 }
  0x31   :  { %1056 = shalt.err (!%p1053_p9)
}
  0x32   :  { %52 = dma.hbm_to_vmem [thread:$0]  %s1203_s4, 1024, %s47_s14, [#allocation8], %s1086_s7, %s1086_s7, %s1087_s8  }
  0x33   :  { %1079 = dma.done.wait [#allocation5], 384  }
  0x34   :  { %1080 = vsyncadd [#allocation5], 4294966912 }
  0x35   :  { %1081 = dma.done.wait [#allocation8], 7168  }
  0x36   :  { %1082 = vsyncadd [#allocation8], 4294960128  ;;  %v933_v0 = vld [vmem:[#allocation7 + $0x40] sm:$0xff]   ;;  %v937_v4 = vld [vmem:[#allocation7 + $0x48] sm:$0xff]   ;;  %v81_v20 = vlaneseq  ;;  %vm1091_vm0 = vmmov 0   ;;  %s1092_s12 = smov [#allocation10]  }
  0x37   :  { %v934_v1 = vld [vmem:[#allocation7 + $0xc0] sm:$0xff]   ;;  %830 = vmatprep.subr.bf16.mxu0 %v933_v0  ;;  %v938_v5 = vld [vmem:[#allocation7 + $0xc8] sm:$0xff]   ;;  %v941_v8 = vld [vmem:[#allocation7 + $0x50] sm:$0xff]   ;;  %s763_s13 = sshll.u32 %s1092_s12, 4  ;;  %s764_s13 = int_to_ptr.vmem [resolvable:$true] %s763_s13 }
  0x38   :  { %v935_v2 = vld [vmem:[#allocation7] sm:$0xff]   ;;  %852 = vmatprep.subr.bf16.mxu1 %v934_v1  ;;  %v939_v6 = vld [vmem:[#allocation7 + $0x8] sm:$0xff]   ;;  %v942_v9 = vld [vmem:[#allocation7 + $0xd0] sm:$0xff]   ;;  %v1170_v25 = vshrl.u32 %v81_v20, 7  ;;  %s1057_s14 = scalar_lea.vmem %s764_s13, 128  ;;  %p1062_p11 = scmp.lt.s32.totalorder %s764_s13, %s764_s13 }
  0x39   :  { %v936_v3 = vld [vmem:[#allocation7 + $0x80] sm:$0xff]   ;;  %831 = vmatpush3.bf16.msra.mxu0 %v935_v2  ;;  %v940_v7 = vld [vmem:[#allocation7 + $0x88] sm:$0xff]   ;;  %v943_v10 = vld [vmem:[#allocation7 + $0x10] sm:$0xff]   ;;  %p1058_p10 = scmp.ne.s32.totalorder %s764_s13, %s1057_s14  ;;  %p1063_p12 = scmp.lt.s32.totalorder %s1057_s14, %s1057_s14 }
  0x3a   :  { %853 = vmatpush3.bf16.msra.mxu1 %v936_v3  ;;  %832 = vmatprep.subr.bf16.mxu0 %v937_v4  ;;  %v944_v11 = vld [vmem:[#allocation7 + $0x90] sm:$0xff]   ;;  %v945_v12 = vld [vmem:[#allocation7 + $0x58] sm:$0xff]   ;;  %v949_v16 = vld [vmem:[#allocation7 + $0x60] sm:$0xff]   ;;  %v87_v30 = vsub.s32 1, %v1170_v25  ;;  %v95_v32 = vsub.s32 3, %v1170_v25  ;;  %v83_v34 = vsub.s32 0, %v1170_v25 }
  0x3b   :  { %854 = vmatprep.subr.bf16.mxu1 %v938_v5  ;;  %v946_v13 = vld [vmem:[#allocation7 + $0xd8] sm:$0xff]   ;;  %v950_v17 = vld [vmem:[#allocation7 + $0xe0] sm:$0xff]   ;;  %v953_v21 = vld [vmem:[#allocation7 + $0x68] sm:$0xff]   ;;  %v91_v36 = vsub.s32 2, %v1170_v25  ;;  %v103_v62 = vsub.s32 5, %v1170_v25  ;;  %p1064_p13 = por %p1063_p12, %p1062_p11 }
  0x3c   :  { %v947_v14 = vld [vmem:[#allocation7 + $0x18] sm:$0xff]   ;;  %v951_v18 = vld [vmem:[#allocation7 + $0x20] sm:$0xff]   ;;  %v954_v22 = vld [vmem:[#allocation7 + $0xe8] sm:$0xff]  }
  0x3d   :  { %833 = vmatpush3.bf16.msra.mxu0 %v939_v6  ;;  %v948_v15 = vld [vmem:[#allocation7 + $0x98] sm:$0xff]   ;;  %v952_v19 = vld [vmem:[#allocation7 + $0xa0] sm:$0xff]   ;;  %v955_v23 = vld [vmem:[#allocation7 + $0x28] sm:$0xff]   ;;  %p1065_p0 = pnand %p1064_p13, %p1058_p10 }
  0x3e   :  { %855 = vmatpush3.bf16.msra.mxu1 %v940_v7  ;;  %834 = vmatprep.subr.bf16.mxu0 %v941_v8  ;;  %v956_v24 = vld [vmem:[#allocation7 + $0xa8] sm:$0xff]   ;;  %v957_v26 = vld [vmem:[#allocation7 + $0x70] sm:$0xff]   ;;  %v961_v31 = vld [vmem:[#allocation7 + $0x78] sm:$0xff]  }
  0x3f   :  { %856 = vmatprep.subr.bf16.mxu1 %v942_v9  ;;  %v958_v27 = vld [vmem:[#allocation7 + $0xf0] sm:$0xff]   ;;  %v962_v33 = vld [vmem:[#allocation7 + $0xf8] sm:$0xff]   ;;  %v70_v38 = vld [vmem:[#allocation4] sm:$0xff] }
  0x40   :  { %v959_v28 = vld [vmem:[#allocation7 + $0x30] sm:$0xff]   ;;  %v963_v35 = vld [vmem:[#allocation7 + $0x38] sm:$0xff]   ;;  %v79_v39 = vld [vmem:[%s1200_s1] sm:$0x3f]  ;;  %v73_v41 = vunpack.c.l.bf16 %v70_v38  ;;  %v74_v42 = vunpack.c.h.bf16 %v70_v38 }
  0x41   :  { %835 = vmatpush3.bf16.msra.mxu0 %v943_v10  ;;  %v960_v29 = vld [vmem:[#allocation7 + $0xb0] sm:$0xff]   ;;  %v964_v37 = vld [vmem:[#allocation7 + $0xb8] sm:$0xff]   ;;  %v88_v43 = vrot.slane %v79_v39, %v87_v30  ;;  %v965_v45 = vld [vmem:[#allocation7 + $0x140] sm:$0xff]   ;;  %v96_v47 = vrot.slane %v79_v39, %v95_v32  ;;  %v84_v48 = vrot.slane %v79_v39, %v83_v34  ;;  %v92_v49 = vrot.slane %v79_v39, %v91_v36 }
  0x42   :  { %857 = vmatpush3.bf16.msra.mxu1 %v944_v11  ;;  %836 = vmatprep.subr.bf16.mxu0 %v945_v12  ;;  %v71_v40 = vld [vmem:[#allocation4 + $0x8] sm:$0xff]  ;;  %v966_v55 = vld [vmem:[#allocation7 + $0x100] sm:$0xff]   ;;  %v967_v59 = vld [vmem:[#allocation7 + $0x148] sm:$0xff]   ;;  %v104_v3 = vrot.slane %v79_v39, %v103_v62  ;;  %v99_v10 = vsub.s32 4, %v1170_v25 }
  0x43   :  { %858 = vmatprep.subr.bf16.mxu1 %v946_v13  ;;  %v75_v44 = vunpack.c.l.bf16 %v71_v40  ;;  %v76_v46 = vunpack.c.h.bf16 %v71_v40  ;;  %v112_v50 = vadd.f32 %v88_v43, %v74_v42  ;;  %v111_v52 = vadd.f32 %v84_v48, %v73_v41  ;;  %v968_v60 = vld [vmem:[#allocation7 + $0x108] sm:$0xff]   ;;  %v969_v61 = vld [vmem:[#allocation7 + $0x150] sm:$0xff]   ;;  %v971_v0 = vld [vmem:[#allocation7 + $0x158] sm:$0xff]  }
  0x44   :  { %v970_v63 = vld [vmem:[#allocation7 + $0x110] sm:$0xff]   ;;  %v972_v1 = vld [vmem:[#allocation7 + $0x118] sm:$0xff]   ;;  %v973_v2 = vld [vmem:[#allocation7 + $0x160] sm:$0xff]  }
  0x45   :  { %837 = vmatpush3.bf16.msra.mxu0 %v947_v14  ;;  %v114_v51 = vadd.f32 %v96_v47, %v76_v46  ;;  %v113_v53 = vadd.f32 %v92_v49, %v75_v44  ;;  %v118_v54 = vpack.c.bf16 %v112_v50, %v112_v50  ;;  %v117_v57 = vpack.c.bf16 %v111_v52, %v111_v52  ;;  %v72_v4 = vld [vmem:[#allocation4 + $0x10] sm:$0xff]  ;;  %v974_v6 = vld [vmem:[#allocation7 + $0x120] sm:$0xff]   ;;  %v975_v8 = vld [vmem:[#allocation7 + $0x168] sm:$0xff]  }
  0x46   :  { %859 = vmatpush3.bf16.msra.mxu1 %v948_v15  ;;  %838 = vmatprep.subr.bf16.mxu0 %v949_v16  ;;  %v78_v5 = vunpack.c.h.bf16 %v72_v4  ;;  %v976_v11 = vld [vmem:[#allocation7 + $0x128] sm:$0xff]   ;;  %v977_v12 = vld [vmem:[#allocation7 + $0x170] sm:$0xff]   ;;  %v77_v13 = vunpack.c.l.bf16 %v72_v4  ;;  %v100_v14 = vrot.slane %v79_v39, %v99_v10  ;;  %v979_v16 = vld [vmem:[#allocation7 + $0x178] sm:$0xff]  }
  0x47   :  { %860 = vmatprep.subr.bf16.mxu1 %v950_v17  ;;  %v120_v56 = vpack.c.bf16 %v114_v51, %v114_v51  ;;  %v119_v58 = vpack.c.bf16 %v113_v53, %v113_v53  ;;  %540 = vmatprep.mubr.bf16.mxu0 %v118_v54  ;;  %v978_v15 = vld [vmem:[#allocation7 + $0x130] sm:$0xff]   ;;  %v981_v20 = vld [vmem:[#allocation9] sm:$0xff]   ;;  %v821_v41 = vld [vmem:[%s1202_s3] ss:$0 sm:$0xff]  ;;  %v754_v54 = vstv %s1204_s5 }
  0x48   :  { %v116_v7 = vadd.f32 %v104_v3, %v78_v5  ;;  %v115_v17 = vadd.f32 %v100_v14, %v77_v13  ;;  %v986_v46 = vld [vmem:[#allocation9 + $0x28] sm:$0xff]   ;;  %v987_v47 = vld [vmem:[#allocation9 + $0x30] sm:$0xff]   ;;  %v988_v48 = vld [vmem:[#allocation9 + $0x38] sm:$0xff]  }
  0x49   :  { %839 = vmatpush3.bf16.msra.mxu0 %v951_v18  ;;  %580 = vmatprep.mubr.bf16.mxu1 %v120_v56  ;;  %v980_v18 = vld [vmem:[#allocation7 + $0x138] sm:$0xff]  }
  0x4a   :  { %861 = vmatpush3.bf16.msra.mxu1 %v952_v19  ;;  %840 = vmatprep.subr.bf16.mxu0 %v953_v21  ;;  %v122_v9 = vpack.c.bf16 %v116_v7, %v116_v7  ;;  %v121_v19 = vpack.c.bf16 %v115_v17, %v115_v17  ;;  %v1090_v21 = vmov 0.0  }
  0x4b   :  { %862 = vmatprep.subr.bf16.mxu1 %v954_v22  ;;  %v982_v22 = vld [vmem:[#allocation9 + $0x8] sm:$0xff]  }
  0x4d   :  { %841 = vmatpush3.bf16.msra.mxu0 %v955_v23  ;;  %v983_v23 = vld [vmem:[#allocation9 + $0x10] sm:$0xff]  }
  0x4e   :  { %863 = vmatpush3.bf16.msra.mxu1 %v956_v24  ;;  %842 = vmatprep.subr.bf16.mxu0 %v957_v26  ;;  %v984_v24 = vld [vmem:[#allocation9 + $0x18] sm:$0xff]  }
  0x4f   :  { %864 = vmatprep.subr.bf16.mxu1 %v958_v27 }
  0x51   :  { %843 = vmatpush3.bf16.msra.mxu0 %v959_v28 }
  0x52   :  { %865 = vmatpush3.bf16.msra.mxu1 %v960_v29  ;;  %844 = vmatprep.subr.bf16.mxu0 %v961_v31 }
  0x53   :  { %866 = vmatprep.subr.bf16.mxu1 %v962_v33 }
  0x55   :  { %845 = vmatpush3.bf16.msra.mxu0 %v963_v35 }
  0x56   :  { %867 = vmatpush3.bf16.msra.mxu1 %v964_v37  ;;  %874 = vmatprep.subr.bf16.mxu0 %v965_v45  ;;  %v985_v45 = vld [vmem:[#allocation9 + $0x20] sm:$0xff]  }
  0x57   :  { %905 = vmatprep.subr.bf16.mxu1 %v1090_v21 }
  0x58   :  { %541 = vmatmul.mubr.bf16.vlgmr.msra.gmra.mrb[0].mxu0 %v117_v57 }
  0x59   :  { %581 = vmatmul.mubr.bf16.vlgmr.msra.gmra.mrb[0].mxu1 %v119_v58  ;;  %875 = vmatpush3.bf16.msra.mxu0 %v966_v55 }
  0x5a   :  { %876 = vmatprep.subr.bf16.mxu0 %v967_v59  ;;  %620 = vmatprep.mubr.bf16.mxu0 %v122_v9 }
  0x5b   :  { %906 = vmatpush3.bf16.msra.mxu1 %v981_v20  ;;  %921 = vmatprep.mubr.msk.bf16.mxu1 %vm1091_vm0, %v1090_v21 }
  0x5c   :  { %907 = vmatprep.subr.bf16.mxu1 %v1090_v21 }
  0x5d   :  { %877 = vmatpush3.bf16.msra.mxu0 %v968_v60 }
  0x5e   :  { %878 = vmatprep.subr.bf16.mxu0 %v969_v61 }
  0x5f   :  { %908 = vmatpush3.bf16.msra.mxu1 %v982_v22 }
  0x60   :  { %909 = vmatprep.subr.bf16.mxu1 %v1090_v21 }
  0x61   :  { %879 = vmatpush3.bf16.msra.mxu0 %v970_v63 }
  0x62   :  { %880 = vmatprep.subr.bf16.mxu0 %v971_v0 }
  0x63   :  { %910 = vmatpush3.bf16.msra.mxu1 %v983_v23 }
  0x64   :  { %911 = vmatprep.subr.bf16.mxu1 %v1090_v21 }
  0x65   :  { %881 = vmatpush3.bf16.msra.mxu0 %v972_v1 }
  0x66   :  { %882 = vmatprep.subr.bf16.mxu0 %v973_v2 }
  0x67   :  { %912 = vmatpush3.bf16.msra.mxu1 %v984_v24 }
  0x68   :  { %913 = vmatprep.subr.bf16.mxu1 %v1090_v21 }
  0x69   :  { %883 = vmatpush3.bf16.msra.mxu0 %v974_v6 }
  0x6a   :  { %884 = vmatprep.subr.bf16.mxu0 %v975_v8 }
  0x6b   :  { %914 = vmatpush3.bf16.msra.mxu1 %v985_v45 }
  0x6c   :  { %915 = vmatprep.subr.bf16.mxu1 %v1090_v21 }
  0x6d   :  { %885 = vmatpush3.bf16.msra.mxu0 %v976_v11 }
  0x6e   :  { %886 = vmatprep.subr.bf16.mxu0 %v977_v12 }
  0x6f   :  { %916 = vmatpush3.bf16.msra.mxu1 %v986_v46 }
  0x70   :  { %917 = vmatprep.subr.bf16.mxu1 %v1090_v21 }
  0x71   :  { %887 = vmatpush3.bf16.msra.mxu0 %v978_v15 }
  0x72   :  { %888 = vmatprep.subr.bf16.mxu0 %v979_v16 }
  0x73   :  { %918 = vmatpush3.bf16.msra.mxu1 %v987_v47 }
  0x74   :  { %919 = vmatprep.subr.bf16.mxu1 %v1090_v21 }
  0x75   :  { %889 = vmatpush3.bf16.msra.mxu0 %v980_v18 }
  0x77   :  { %920 = vmatpush3.bf16.msra.mxu1 %v988_v48 }
  0x78   :  { %621 = vmatmul.mubr.bf16.vlgmr.msra.gmra.mrb[4].mxu0 %v121_v19 }
 0x12b   :  { %v846_v25 = vpop.f32.mrb[0].mxu0 }
 0x12c   :  { %v868_v26 = vpop.f32.mrb[0].mxu1  ;;  %v847_v27 = vpop.f32.mrb[1].mxu0 }
 0x12d   :  { %v848_v28 = vadd.f32 %v847_v27, %v846_v25  ;;  %v869_v29 = vpop.f32.mrb[1].mxu1  ;;  %v849_v30 = vpop.f32.mrb[2].mxu0 }
 0x12e   :  { %v870_v31 = vadd.f32 %v869_v29, %v868_v26  ;;  %v850_v32 = vpop.f32.mrb[3].mxu0  ;;  %v871_v33 = vpop.f32.mrb[2].mxu1 }
 0x12f   :  { %v872_v34 = vpop.f32.mrb[3].mxu1 }
 0x130   :  { %v583_v35 = vadd.f32 %v870_v31, %v848_v28 }
 0x14b   :  { %v890_v36 = vpop.f32.mrb[4].mxu0 }
 0x14c   :  { %v891_v37 = vpop.f32.mrb[5].mxu0 }
 0x14d   :  { %v892_v38 = vadd.f32 %v891_v37, %v890_v36  ;;  %v893_v39 = vpop.f32.mrb[6].mxu0 }
 0x14e   :  { %v894_v40 = vpop.f32.mrb[7].mxu0 }
 0x14f   :  { %v623_v42 = vadd.f32 %v892_v38, %v583_v35 }
 0x151   :  { %v641_v43 = vadd.f32 %v821_v41, %v623_v42 }
 0x153   :  { %v642_v44 = vmul.f32 %v641_v43, %v641_v43 }
 0x155   :  { %643 = vadd.xlane.f32.xlu0 %v642_v44 }
 0x1e2   :  { %v644_v49 = vpop.xlane.xlu0 %643 }
 0x1e3   :  { %v645_v50 = vadd.f32 1e-12, %v644_v49 }
 0x1e5   :  { %989 = vrsqrt.f32 %v645_v50 }
 0x1ef   :  { %v990_v51 = vpop.eup %989 }
 0x1f0   :  { %v647_v52 = vmul.f32 %v990_v51, %v641_v43 }
 0x1f2   :  { %v648_v53 = vpack.c.bf16 %v647_v52, %v647_v52 }
 0x1f4   :  { %922 = vmatmul.mubr.bf16.vlgmr.msra.gmra.mrb[4].mxu1 %v648_v53 }
 0x2c7   :  { %v747_v55 = vpop.f32.mrb[4].mxu1 }
 0x2c8   :  { %v755_v56 = vmul.f32 %v754_v54, %v747_v55  ;;  %v923_v57 = vpop.f32.mrb[5].mxu1 }
 0x2c9   :  { %v750_v58 = vpop.f32.mrb[6].mxu1 }
 0x2ca   :  { %756 = vst [vmem:[#allocation10] sm:$0xff] %v755_v56  ;;  %v924_v59 = vpop.f32.mrb[7].mxu1 }
 0x2cb   :  { %1068 = shalt.err (!%p1065_p0)
}
 0x2cc   :  { %s1069_s5 = scalar_lea.hbm %s1205_s6, 128 }
 0x2cd   :  { %p1070_p1 = scmp.ne.s32.totalorder %s1205_s6, %s1069_s5  ;;  %p1073_p2 = scmp.lt.u32.totalorder %s1069_s5, %s1205_s6 }
 0x2cf   :  { %p1075_p3 = pnand %p1073_p2, %p1070_p1 }
 0x2d1   :  { %1078 = shalt.err (!%p1075_p3)
}
 0x2d2   :  { %766 = dma.vmem_to_hbm [thread:$0]  %s764_s13, 128, %s1205_s6, [#allocation6]  }
 0x2d3   :  { %1083 = dma.done.wait [#allocation6], 128  }
 0x2d4   :  { %1084 = vsyncadd [#allocation6], 4294967168 }
 0x2d5   :  { %770 = vsyncpa [#allocation5], 1 }
 0x2d6   :  { %771 = vsyncpa [#allocation8], 1 }
 0x2d7   :  { %772 = vsyncpa [#allocation6], 1 }

</bundles_post_ra>
